<compile_context>
chip_gen: v6e
topology: v6e:2x2x1
jax: 0.10.0
libtpu: 0.0.40
codegen_flags: <defaults>
</compile_context>

<pallas_src>
import functools

import jax
import jax.numpy as jnp
import numpy as np
from jax.experimental import pallas as pl
from jax.experimental.pallas import tpu as pltpu

EPS = 1e-5
VMEM_LIMIT = 32 * 1024 * 1024   # safe on v5e/v6e (128 MiB) and well below v7x's 64 MiB


def _conv_stats_kernel(xs_ref, b_ref, y_ref, stats_ref, im2col_ref, *, Th, Wo, C, Cp):
    """Fused conv3x3-stride2 (+ folded avgpool/1x1 residual) + per-tile BN partial stats.

    xs_ref    : (1, 1, Th+1, Wo+1, 4*C) bf16  space-to-depth row tile of the padded image
    b_ref     : (9*C, Cp)               bf16  fused weight matrix (residual folded in)
    y_ref     : (1, Th, Wo, Cp)         bf16  pre-BN activations for this tile
    stats_ref : (1, 1, 2, Cp)           f32   per-tile [sum, sum_sq] partials
    im2col_ref: (Th, Wo, 9*C)           bf16  VMEM scratch im2col tile (never hits HBM)
    """
    # Gather the 9 taps into the im2col scratch (static slices only, all in VMEM).
    for ky in range(3):
        for kx in range(3):
            t = ky * 3 + kx
            s = (ky % 2) * 2 + (kx % 2)          # sub-position inside the 2x2 cell
            im2col_ref[:, :, t * C:(t + 1) * C] = xs_ref[
                0, 0,
                ky // 2: ky // 2 + Th,
                kx // 2: kx // 2 + Wo,
                s * C:(s + 1) * C]

    # ONE matmul with contraction depth K = 9*C: accumulation stays inside the MXU
    # (in-place MRB accumulation on v7x) instead of 9 VMEM read-modify-write passes.
    a = im2col_ref[...].reshape(Th * Wo, 9 * C)
    acc = jnp.dot(a, b_ref[...], preferred_element_type=jnp.float32)    # (Th*Wo, Cp) f32

    y_ref[...] = acc.reshape(1, Th, Wo, Cp).astype(y_ref.dtype)

    # Partial BN statistics from the f32 accumulator (before the bf16 downcast).
    stats_ref[0, 0, 0:1, :] = jnp.sum(acc, axis=0, keepdims=True)
    stats_ref[0, 0, 1:2, :] = jnp.sum(acc * acc, axis=0, keepdims=True)


def _bn_relu_kernel(y_ref, scale_ref, shift_ref, o_ref):
    """o = max(y * scale + shift, 0); un-pads channels in-kernel (no extra XLA slice pass)."""
    y = y_ref[...].astype(jnp.float32)                   # (1, Th, Wo, Cp)
    sc = scale_ref[...].reshape(1, 1, 1, -1)
    sh = shift_ref[...].reshape(1, 1, 1, -1)
    r = jnp.maximum(y * sc + sh, 0.0)
    o_ref[...] = r[..., : o_ref.shape[-1]]


def residual_downsample(x_nchw, w3, b3, w1, b1, gamma, beta):
    # Constant per-channel conv biases cancel exactly through training-mode BatchNorm
    # (batch mean absorbs them, shift compensates), so they are not used at all.
    del b3, b1

    N, C, H, W = x_nchw.shape
    assert H % 2 == 0 and W % 2 == 0, "module requires even spatial dims"
    Co = 2 * C
    Ho, Wo = H // 2, W // 2

    # Lane-dense channel padding only when it is cheap: for small Co (< 128) accept masked
    # stores instead of inflating the memory-bound y/out HBM traffic up to 16x.
    Cp = ((Co + 127) // 128) * 128 if Co >= 128 else Co

    # Row-tile height: largest divisor of Ho with Th*Wo <= ~256 accumulator rows.
    target_rows = 256
    Th = 1
    for d in range(1, Ho + 1):
        if Ho % d == 0 and d * Wo <= max(target_rows, Wo):
            Th = d
    nH = Ho // Th

    # ---- glue: pad + ONE space-to-depth transpose, then pre-duplicate the 1-row overlap ----
    # xs[n, hb, wb, (2*hs+ws)*C + c] = x_padded[n, c, 2*hb+hs, 2*wb+ws]
    xp = jnp.pad(x_nchw.astype(jnp.bfloat16), ((0, 0), (0, 0), (1, 1), (1, 1)))
    xs = xp.reshape(N, C, Ho + 1, 2, Wo + 1, 2)
    xs = jnp.transpose(xs, (0, 2, 4, 3, 5, 1)).reshape(N, Ho + 1, Wo + 1, 4 * C)
    idx = jnp.arange(nH)[:, None] * Th + jnp.arange(Th + 1)[None, :]      # (nH, Th+1)
    xs_tiled = xs[:, idx]                                # (N, nH, Th+1, Wo+1, 4C), bf16

    # ---- fused weights: fold the avgpool->conv1x1 residual into the 3x3 taps ----
    B4 = jnp.transpose(w3.astype(jnp.float32), (2, 3, 1, 0))               # (3, 3, C, Co)
    res = jnp.transpose(w1[:, :, 0, 0].astype(jnp.float32), (1, 0)) / 4.0  # (C, Co)
    B4 = B4.at[1:3, 1:3].add(res)                        # taps {1,2}x{1,2} of the 3x3 window
    Bm = B4.reshape(9 * C, Co)
    if Cp > Co:
        Bm = jnp.pad(Bm, ((0, 0), (0, Cp - Co)))
    Bm = Bm.astype(jnp.bfloat16)

    # ---- kernel 1: row-tiled im2col + single big-K matmul + per-tile BN partial stats ----
    kern1 = functools.partial(_conv_stats_kernel, Th=Th, Wo=Wo, C=C, Cp=Cp)
    y, stats = pl.pallas_call(
        kern1,
        out_shape=(jax.ShapeDtypeStruct((N, Ho, Wo, Cp), jnp.bfloat16),
                   jax.ShapeDtypeStruct((N, nH, 2, Cp), jnp.float32)),
        grid_spec=pltpu.PrefetchScalarGridSpec(
            num_scalar_prefetch=0,
            grid=(N, nH),
            in_specs=[
                # TODO(synk): if xprof shows exposed DMA on v5e/v6e, raise this spec to
                #             pipeline_mode=pl.Buffered(3) (not on v7x: only 64 MiB VMEM).
                pl.BlockSpec((1, 1, Th + 1, Wo + 1, 4 * C),
                             lambda n, h: (n, h, 0, 0, 0)),
                pl.BlockSpec((9 * C, Cp), lambda n, h: (0, 0)),
            ],
            out_specs=(pl.BlockSpec((1, Th, Wo, Cp), lambda n, h: (n, h, 0, 0)),
                       pl.BlockSpec((1, 1, 2, Cp), lambda n, h: (n, h, 0, 0))),
            scratch_shapes=[pltpu.VMEM((Th, Wo, 9 * C), jnp.bfloat16)]),
        compiler_params=pltpu.CompilerParams(
            dimension_semantics=("parallel", "parallel"),
            vmem_limit_bytes=VMEM_LIMIT),
    )(xs_tiled, Bm)

    # ---- tiny wrapper math: reduce partial stats, precompute BN scale/shift once ----
    # TODO(synk): single-pass E[y^2]-mean^2 variance is cancellation-prone if |mean|>>std;
    #             a per-tile shifted sum-of-squares would fix it without re-reading y.
    s = jnp.sum(stats, axis=(0, 1))                      # (2, Cp)
    m_total = float(N * Ho * Wo)
    mean = s[0] / m_total
    var = s[1] / m_total - mean * mean                   # biased variance (PyTorch BN train)
    inv = jax.lax.rsqrt(var + EPS)
    gamma_p = jnp.pad(gamma.astype(jnp.float32), (0, Cp - Co))
    beta_p = jnp.pad(beta.astype(jnp.float32), (0, Cp - Co))
    scale = (gamma_p * inv).reshape(1, Cp)
    shift = (beta_p - mean * gamma_p * inv).reshape(1, Cp)

    # ---- kernel 2: BN (affine) + ReLU + channel un-pad (y bf16 -> out f32, so no aliasing) ----
    out_nhwc = pl.pallas_call(
        _bn_relu_kernel,
        out_shape=jax.ShapeDtypeStruct((N, Ho, Wo, Co), jnp.float32),
        grid_spec=pltpu.PrefetchScalarGridSpec(
            num_scalar_prefetch=0,
            grid=(N, nH),
            in_specs=[pl.BlockSpec((1, Th, Wo, Cp), lambda n, h: (n, h, 0, 0)),
                      pl.BlockSpec((1, Cp), lambda n, h: (0, 0)),
                      pl.BlockSpec((1, Cp), lambda n, h: (0, 0))],
            out_specs=pl.BlockSpec((1, Th, Wo, Co), lambda n, h: (n, h, 0, 0))),
        compiler_params=pltpu.CompilerParams(
            dimension_semantics=("parallel", "parallel"),
            vmem_limit_bytes=VMEM_LIMIT),
    )(y, scale, shift)

    # TODO(synk): final NHWC->NCHW transpose kept only to match the PyTorch module's
    #             interface; drop it (or fuse it into kernel 2) if downstream accepts NHWC.
    return jnp.transpose(out_nhwc, (0, 3, 1, 2))


def _reference(x, w3, b3, w1, b1, gamma, beta):
    dn = ('NCHW', 'OIHW', 'NCHW')
    hp = jax.lax.Precision.HIGHEST
    y1 = jax.lax.conv_general_dilated(x, w3, (2, 2), ((1, 1), (1, 1)),
                                      dimension_numbers=dn, precision=hp)
    y1 = y1 + b3[None, :, None, None]
    xpool = jax.lax.reduce_window(x, 0.0, jax.lax.add,
                                  (1, 1, 2, 2), (1, 1, 2, 2), 'VALID') / 4.0
    y2 = jax.lax.conv_general_dilated(xpool, w1, (1, 1), 'VALID',
                                      dimension_numbers=dn, precision=hp)
    y2 = y2 + b1[None, :, None, None]
    y = y1 + y2
    mean = jnp.mean(y, axis=(0, 2, 3), keepdims=True)
    var = jnp.mean((y - mean) ** 2, axis=(0, 2, 3), keepdims=True)
    yn = (y - mean) * jax.lax.rsqrt(var + EPS)
    yn = yn * gamma[None, :, None, None] + beta[None, :, None, None]
    return jnp.maximum(yn, 0.0)


if __name__ == "__main__":
    key = jax.random.PRNGKey(0)
    k_x, k_w3, k_b3, k_w1, k_b1 = jax.random.split(key, 5)

    N, C, H, W = 2, 4, 16, 16
    Co = 2 * C

    x = jax.random.normal(k_x, (N, C, H, W), dtype=jnp.float32)
    # Deterministic parameter init (shapes per the nn.Module __init__).
    w3 = 0.1 * jax.random.normal(k_w3, (Co, C, 3, 3), dtype=jnp.float32)
    b3 = 0.1 * jax.random.normal(k_b3, (Co,), dtype=jnp.float32)
    w1 = 0.1 * jax.random.normal(k_w1, (Co, C, 1, 1), dtype=jnp.float32)
    b1 = 0.1 * jax.random.normal(k_b1, (Co,), dtype=jnp.float32)
    gamma = jnp.ones((Co,), dtype=jnp.float32)   # BatchNorm2d default weight
    beta = jnp.zeros((Co,), dtype=jnp.float32)   # BatchNorm2d default bias

    out = residual_downsample(x, w3, b3, w1, b1, gamma, beta)
    out = jax.block_until_ready(out)

    ref = _reference(x, w3, b3, w1, b1, gamma, beta)
    # Tolerance reflects the bf16 input / intermediate path (reference is f32 HIGHEST).
    np.testing.assert_allclose(np.asarray(out), np.asarray(ref), rtol=2e-2, atol=2e-2)

    print("KERNEL_OK")
</pallas_src>

<mosaic_0001>
module attributes {stable_mosaic.version = 11 : i64} {
  func.func @_conv_stats_kernel(%arg0: i32, %arg1: i32, %arg2: memref<1x1x9x9x16xbf16, #tpu.memory_space<vmem>>, %arg3: memref<36x8xbf16, #tpu.memory_space<vmem>>, %arg4: memref<1x8x8x8xbf16, #tpu.memory_space<vmem>>, %arg5: memref<1x1x2x8xf32, #tpu.memory_space<vmem>>, %arg6: memref<8x8x36xbf16, #tpu.memory_space<vmem>>) attributes {dimension_semantics = [#tpu.dimension_semantics<parallel>, #tpu.dimension_semantics<parallel>], iteration_bounds = array<i64: 2, 1>, scalar_prefetch = 0 : i64, scratch_operands = 1 : i64, tpu.core_type = #tpu.core_type<tc>, window_params = [{transform_indices = @transform_0, window_bounds = array<i64: 1, 1, 9, 9, 16>}, {pipeline_mode = #tpu.pipeline_mode<synchronous>, transform_indices = @transform_1, window_bounds = array<i64: 36, 8>}, {transform_indices = @transform_2, window_bounds = array<i64: 1, 8, 8, 8>}, {transform_indices = @transform_3, window_bounds = array<i64: 1, 1, 2, 8>}]} {
    %c0 = arith.constant 0 : index
    %c0_0 = arith.constant 0 : index
    %c0_1 = arith.constant 0 : index
    %c0_2 = arith.constant 0 : index
    %c0_3 = arith.constant 0 : index
    %0 = vector.load %arg2[%c0, %c0_0, %c0_1, %c0_2, %c0_3] : memref<1x1x9x9x16xbf16, #tpu.memory_space<vmem>>, vector<1x1x8x8x4xbf16>
    %1 = vector.shape_cast %0 : vector<1x1x8x8x4xbf16> to vector<8x8x4xbf16>
    %c0_4 = arith.constant 0 : index
    %c0_5 = arith.constant 0 : index
    %c0_6 = arith.constant 0 : index
    %2 = vector.load %arg6[%c0_4, %c0_5, %c0_6] : memref<8x8x36xbf16, #tpu.memory_space<vmem>>, vector<8x8x4xbf16>
    tpu.vector_store %arg6[%c0_4, %c0_5, %c0_6], %1 {strides = array<i32>} : memref<8x8x36xbf16, #tpu.memory_space<vmem>>, vector<8x8x4xbf16>,
    %c0_7 = arith.constant 0 : index
    %c0_8 = arith.constant 0 : index
    %c0_9 = arith.constant 0 : index
    %c0_10 = arith.constant 0 : index
    %c4 = arith.constant 4 : index
    %3 = vector.load %arg2[%c0_7, %c0_8, %c0_9, %c0_10, %c4] : memref<1x1x9x9x16xbf16, #tpu.memory_space<vmem>>, vector<1x1x8x8x4xbf16>
    %4 = vector.shape_cast %3 : vector<1x1x8x8x4xbf16> to vector<8x8x4xbf16>
    %c0_11 = arith.constant 0 : index
    %c0_12 = arith.constant 0 : index
    %c4_13 = arith.constant 4 : index
    %5 = vector.load %arg6[%c0_11, %c0_12, %c4_13] : memref<8x8x36xbf16, #tpu.memory_space<vmem>>, vector<8x8x4xbf16>
    tpu.vector_store %arg6[%c0_11, %c0_12, %c4_13], %4 {strides = array<i32>} : memref<8x8x36xbf16, #tpu.memory_space<vmem>>, vector<8x8x4xbf16>,
    %c0_14 = arith.constant 0 : index
    %c0_15 = arith.constant 0 : index
    %c0_16 = arith.constant 0 : index
    %c1 = arith.constant 1 : index
    %c0_17 = arith.constant 0 : index
    %6 = vector.load %arg2[%c0_14, %c0_15, %c0_16, %c1, %c0_17] : memref<1x1x9x9x16xbf16, #tpu.memory_space<vmem>>, vector<1x1x8x8x4xbf16>
    %7 = vector.shape_cast %6 : vector<1x1x8x8x4xbf16> to vector<8x8x4xbf16>
    %c0_18 = arith.constant 0 : index
    %c0_19 = arith.constant 0 : index
    %c8 = arith.constant 8 : index
    %8 = vector.load %arg6[%c0_18, %c0_19, %c8] : memref<8x8x36xbf16, #tpu.memory_space<vmem>>, vector<8x8x4xbf16>
    tpu.vector_store %arg6[%c0_18, %c0_19, %c8], %7 {strides = array<i32>} : memref<8x8x36xbf16, #tpu.memory_space<vmem>>, vector<8x8x4xbf16>,
    %c0_20 = arith.constant 0 : index
    %c0_21 = arith.constant 0 : index
    %c0_22 = arith.constant 0 : index
    %c0_23 = arith.constant 0 : index
    %c8_24 = arith.constant 8 : index
    %9 = vector.load %arg2[%c0_20, %c0_21, %c0_22, %c0_23, %c8_24] : memref<1x1x9x9x16xbf16, #tpu.memory_space<vmem>>, vector<1x1x8x8x4xbf16>
    %10 = vector.shape_cast %9 : vector<1x1x8x8x4xbf16> to vector<8x8x4xbf16>
    %c0_25 = arith.constant 0 : index
    %c0_26 = arith.constant 0 : index
    %c12 = arith.constant 12 : index
    %11 = vector.load %arg6[%c0_25, %c0_26, %c12] : memref<8x8x36xbf16, #tpu.memory_space<vmem>>, vector<8x8x4xbf16>
    tpu.vector_store %arg6[%c0_25, %c0_26, %c12], %10 {strides = array<i32>} : memref<8x8x36xbf16, #tpu.memory_space<vmem>>, vector<8x8x4xbf16>,
    %c0_27 = arith.constant 0 : index
    %c0_28 = arith.constant 0 : index
    %c0_29 = arith.constant 0 : index
    %c0_30 = arith.constant 0 : index
    %c12_31 = arith.constant 12 : index
    %12 = vector.load %arg2[%c0_27, %c0_28, %c0_29, %c0_30, %c12_31] : memref<1x1x9x9x16xbf16, #tpu.memory_space<vmem>>, vector<1x1x8x8x4xbf16>
    %13 = vector.shape_cast %12 : vector<1x1x8x8x4xbf16> to vector<8x8x4xbf16>
    %c0_32 = arith.constant 0 : index
    %c0_33 = arith.constant 0 : index
    %c16 = arith.constant 16 : index
    %14 = vector.load %arg6[%c0_32, %c0_33, %c16] : memref<8x8x36xbf16, #tpu.memory_space<vmem>>, vector<8x8x4xbf16>
    tpu.vector_store %arg6[%c0_32, %c0_33, %c16], %13 {strides = array<i32>} : memref<8x8x36xbf16, #tpu.memory_space<vmem>>, vector<8x8x4xbf16>,
    %c0_34 = arith.constant 0 : index
    %c0_35 = arith.constant 0 : index
    %c0_36 = arith.constant 0 : index
    %c1_37 = arith.constant 1 : index
    %c8_38 = arith.constant 8 : index
    %15 = vector.load %arg2[%c0_34, %c0_35, %c0_36, %c1_37, %c8_38] : memref<1x1x9x9x16xbf16, #tpu.memory_space<vmem>>, vector<1x1x8x8x4xbf16>
    %16 = vector.shape_cast %15 : vector<1x1x8x8x4xbf16> to vector<8x8x4xbf16>
    %c0_39 = arith.constant 0 : index
    %c0_40 = arith.constant 0 : index
    %c20 = arith.constant 20 : index
    %17 = vector.load %arg6[%c0_39, %c0_40, %c20] : memref<8x8x36xbf16, #tpu.memory_space<vmem>>, vector<8x8x4xbf16>
    tpu.vector_store %arg6[%c0_39, %c0_40, %c20], %16 {strides = array<i32>} : memref<8x8x36xbf16, #tpu.memory_space<vmem>>, vector<8x8x4xbf16>,
    %c0_41 = arith.constant 0 : index
    %c0_42 = arith.constant 0 : index
    %c1_43 = arith.constant 1 : index
    %c0_44 = arith.constant 0 : index
    %c0_45 = arith.constant 0 : index
    %18 = vector.load %arg2[%c0_41, %c0_42, %c1_43, %c0_44, %c0_45] : memref<1x1x9x9x16xbf16, #tpu.memory_space<vmem>>, vector<1x1x8x8x4xbf16>
    %19 = vector.shape_cast %18 : vector<1x1x8x8x4xbf16> to vector<8x8x4xbf16>
    %c0_46 = arith.constant 0 : index
    %c0_47 = arith.constant 0 : index
    %c24 = arith.constant 24 : index
    %20 = vector.load %arg6[%c0_46, %c0_47, %c24] : memref<8x8x36xbf16, #tpu.memory_space<vmem>>, vector<8x8x4xbf16>
    tpu.vector_store %arg6[%c0_46, %c0_47, %c24], %19 {strides = array<i32>} : memref<8x8x36xbf16, #tpu.memory_space<vmem>>, vector<8x8x4xbf16>,
    %c0_48 = arith.constant 0 : index
    %c0_49 = arith.constant 0 : index
    %c1_50 = arith.constant 1 : index
    %c0_51 = arith.constant 0 : index
    %c4_52 = arith.constant 4 : index
    %21 = vector.load %arg2[%c0_48, %c0_49, %c1_50, %c0_51, %c4_52] : memref<1x1x9x9x16xbf16, #tpu.memory_space<vmem>>, vector<1x1x8x8x4xbf16>
    %22 = vector.shape_cast %21 : vector<1x1x8x8x4xbf16> to vector<8x8x4xbf16>
    %c0_53 = arith.constant 0 : index
    %c0_54 = arith.constant 0 : index
    %c28 = arith.constant 28 : index
    %23 = vector.load %arg6[%c0_53, %c0_54, %c28] : memref<8x8x36xbf16, #tpu.memory_space<vmem>>, vector<8x8x4xbf16>
    tpu.vector_store %arg6[%c0_53, %c0_54, %c28], %22 {strides = array<i32>} : memref<8x8x36xbf16, #tpu.memory_space<vmem>>, vector<8x8x4xbf16>,
    %c0_55 = arith.constant 0 : index
    %c0_56 = arith.constant 0 : index
    %c1_57 = arith.constant 1 : index
    %c1_58 = arith.constant 1 : index
    %c0_59 = arith.constant 0 : index
    %24 = vector.load %arg2[%c0_55, %c0_56, %c1_57, %c1_58, %c0_59] : memref<1x1x9x9x16xbf16, #tpu.memory_space<vmem>>, vector<1x1x8x8x4xbf16>
    %25 = vector.shape_cast %24 : vector<1x1x8x8x4xbf16> to vector<8x8x4xbf16>
    %c0_60 = arith.constant 0 : index
    %c0_61 = arith.constant 0 : index
    %c32 = arith.constant 32 : index
    %26 = vector.load %arg6[%c0_60, %c0_61, %c32] : memref<8x8x36xbf16, #tpu.memory_space<vmem>>, vector<8x8x4xbf16>
    tpu.vector_store %arg6[%c0_60, %c0_61, %c32], %25 {strides = array<i32>} : memref<8x8x36xbf16, #tpu.memory_space<vmem>>, vector<8x8x4xbf16>,
    %c0_62 = arith.constant 0 : index
    %c0_63 = arith.constant 0 : index
    %c0_64 = arith.constant 0 : index
    %27 = vector.load %arg6[%c0_62, %c0_63, %c0_64] : memref<8x8x36xbf16, #tpu.memory_space<vmem>>, vector<8x8x36xbf16>
    %28 = vector.shape_cast %27 : vector<8x8x36xbf16> to vector<64x36xbf16>
    %c0_65 = arith.constant 0 : index
    %c0_66 = arith.constant 0 : index
    %29 = vector.load %arg3[%c0_65, %c0_66] : memref<36x8xbf16, #tpu.memory_space<vmem>>, vector<36x8xbf16>
    %cst = arith.constant dense<0.000000e+00> : vector<64x8xf32>
    %30 = tpu.matmul %28, %29, %cst {dimension_numbers = #tpu.dot_dimension_numbers<[1], [0], [0], [1], [0, 0, 1, 1], [], []>} : vector<64x36xbf16>, vector<36x8xbf16>, vector<64x8xf32> -> vector<64x8xf32>
    %31 = vector.shape_cast %30 : vector<64x8xf32> to vector<1x8x8x8xf32>
    %32 = arith.truncf %31 : vector<1x8x8x8xf32> to vector<1x8x8x8xbf16>
    %c0_67 = arith.constant 0 : index
    %c0_68 = arith.constant 0 : index
    %c0_69 = arith.constant 0 : index
    %c0_70 = arith.constant 0 : index
    %33 = vector.load %arg4[%c0_67, %c0_68, %c0_69, %c0_70] : memref<1x8x8x8xbf16, #tpu.memory_space<vmem>>, vector<1x8x8x8xbf16>
    tpu.vector_store %arg4[%c0_67, %c0_68, %c0_69, %c0_70], %32 {strides = array<i32>} : memref<1x8x8x8xbf16, #tpu.memory_space<vmem>>, vector<1x8x8x8xbf16>,
    %cst_71 = arith.constant dense<0.000000e+00> : vector<8xf32>
    %34 = vector.multi_reduction <add>, %30, %cst_71 [0] : vector<64x8xf32> to vector<8xf32>
    %35 = vector.shape_cast %34 : vector<8xf32> to vector<1x8xf32>
    %c0_72 = arith.constant 0 : index
    %c0_73 = arith.constant 0 : index
    %c0_74 = arith.constant 0 : index
    %c0_75 = arith.constant 0 : index
    %36 = vector.load %arg5[%c0_72, %c0_73, %c0_74, %c0_75] : memref<1x1x2x8xf32, #tpu.memory_space<vmem>>, vector<1x1x1x8xf32>
    %37 = vector.shape_cast %36 : vector<1x1x1x8xf32> to vector<1x8xf32>
    %38 = vector.shape_cast %35 : vector<1x8xf32> to vector<1x1x1x8xf32>
    tpu.vector_store %arg5[%c0_72, %c0_73, %c0_74, %c0_75], %38 {strides = array<i32>} : memref<1x1x2x8xf32, #tpu.memory_space<vmem>>, vector<1x1x1x8xf32>,
    %39 = arith.mulf %30, %30 : vector<64x8xf32>
    %cst_76 = arith.constant dense<0.000000e+00> : vector<8xf32>
    %40 = vector.multi_reduction <add>, %39, %cst_76 [0] : vector<64x8xf32> to vector<8xf32>
    %41 = vector.shape_cast %40 : vector<8xf32> to vector<1x8xf32>
    %c0_77 = arith.constant 0 : index
    %c0_78 = arith.constant 0 : index
    %c1_79 = arith.constant 1 : index
    %c0_80 = arith.constant 0 : index
    %42 = vector.load %arg5[%c0_77, %c0_78, %c1_79, %c0_80] : memref<1x1x2x8xf32, #tpu.memory_space<vmem>>, vector<1x1x1x8xf32>
    %43 = vector.shape_cast %42 : vector<1x1x1x8xf32> to vector<1x8xf32>
    %44 = vector.shape_cast %41 : vector<1x8xf32> to vector<1x1x1x8xf32>
    tpu.vector_store %arg5[%c0_77, %c0_78, %c1_79, %c0_80], %44 {strides = array<i32>} : memref<1x1x2x8xf32, #tpu.memory_space<vmem>>, vector<1x1x1x8xf32>,
    return
  }
  func.func @transform_0(%arg0: i32, %arg1: i32) -> (i32, i32, i32, i32, i32) {
    %c0_i32 = arith.constant 0 : i32
    %c0_i32_0 = arith.constant 0 : i32
    %c0_i32_1 = arith.constant 0 : i32
    %c0_i32_2 = arith.constant 0 : i32
    return %arg0, %arg1, %c0_i32, %c0_i32_0, %c0_i32_1 : i32, i32, i32, i32, i32
  }
  func.func @transform_1(%arg0: i32, %arg1: i32) -> (i32, i32) {
    %c0_i32 = arith.constant 0 : i32
    %c0_i32_0 = arith.constant 0 : i32
    %c0_i32_1 = arith.constant 0 : i32
    return %c0_i32, %c0_i32_0 : i32, i32
  }
  func.func @transform_2(%arg0: i32, %arg1: i32) -> (i32, i32, i32, i32) {
    %c0_i32 = arith.constant 0 : i32
    %c0_i32_0 = arith.constant 0 : i32
    %c0_i32_1 = arith.constant 0 : i32
    return %arg0, %arg1, %c0_i32, %c0_i32_0 : i32, i32, i32, i32
  }
  func.func @transform_3(%arg0: i32, %arg1: i32) -> (i32, i32, i32, i32) {
    %c0_i32 = arith.constant 0 : i32
    %c0_i32_0 = arith.constant 0 : i32
    %c0_i32_1 = arith.constant 0 : i32
    return %arg0, %arg1, %c0_i32, %c0_i32_0 : i32, i32, i32, i32
  }
}

</mosaic_0001>

<bundles_post_ra>
// kernel: tpu_custom_call.1
= control target key start
LH: loop header
LB: loop body
LE: loop exit
PB: predicated region body
PF: predicated region fallthrough
CT: control target
= control target key end

     0   :  { %9 = vsyncpa [#allocation4], 0  ;;  %s2061_s0 = inlined_call_operand.vmem [shape: bf16[2,1,9,9,16], index: 0, kind: input, shape index: {}]   ;;  %s2062_s1 = inlined_call_operand.vmem [shape: bf16[36,8], index: 1, kind: input, shape index: {}]   ;;  %s2063_s2 = inlined_call_operand.hbm [shape: bf16[2,8,8,8], index: 2, kind: output, shape index: {0}]   ;;  %s2064_s3 = inlined_call_operand.hbm [shape: f32[2,1,2,8], index: 3, kind: output, shape index: {1}]  }
   0x1   :  { %11 = vsyncpa [#allocation4 + $0x1], 0 }
   0x2   :  { %12 = vsyncpa [#allocation6], 0 }
   0x3   :  { %14 = vsyncpa [#allocation6 + $0x1], 0  ;;  %s1578_s12 = smov 0   ;;  %s1580_s13 = smov 0  }
   0x4   :  { %s1582_s14 = smov 0   ;;  %s1584_s15 = smov 0  }
   0x5   :  { %s1586_s16 = smov 0   ;;  %s1588_s17 = smov 0  }
   0x6 LB: > { %s1280_s18 = sadd.s32 4294967295, %s1548_s17   ;;  %s1281_s19 = sadd.s32 4294967294, %s1548_s17   ;;  %s1548_s17 = sphi %s1588_s17, %s20_s17   ;;  %s1544_s16 = sphi %s1586_s16, %s2073_s16   ;;  %s1540_s15 = sphi %s1584_s15, %s2072_s15   ;;  %s1536_s14 = sphi %s1582_s14, %s2071_s14   ;;  %s1532_s13 = sphi %s1580_s13, %s2070_s13   ;;  %s1528_s12 = sphi %s1578_s12, %s2069_s12  }
   0x7   : > { %s32_s20 = sadd.s32 1, %s1544_s16  ;;  %s90_s21 = sadd.s32 1, %s1536_s14 }
   0x8   : > { %p34_p0 = scmp.ge.s32.totalorder %s32_s20, 2  ;;  %p100_p1 = scmp.ne.s32.totalorder %s1536_s14, %s1532_s13 }
   0x9   : > { %p101_p2 = scmp.eq.s32.totalorder %s1280_s18, 1  ;;  %p106_p3 = scmp.ne.s32.totalorder %s1532_s13, %s1528_s12 }
   0xa   : > { %s2075_s20 = smov (%p34_p0, %s32_s20), 0  ;;  %p107_p5 = scmp.eq.s32.totalorder %s1281_s19, 1 }
   0xb   : > { %p1618_p4 = por %p101_p2, %p100_p1  ;;  %s85_s23 = ssub.s32 %s1544_s16, %s2075_s20 }
   0xc   : > { %p1284_p6 = scmp.ge.s32.totalorder %s1548_s17, 1  ;;  %p88_p7 = scmp.eq.s32.totalorder %s85_s23, 0 }
   0xd   : > { %p1625_p8 = por %p107_p5, %p106_p3  ;;  %p168_p9 = scmp.lt.s32.totalorder %s1548_s17, 3 }
   0xe   : > { %s1631_s25 = scalar_select %p88_p7, %s1536_s14, %s90_s21  }
   0xf   : > { %p169_p10 = pnand %p1284_p6, %p168_p9 }
  0x10   : > { %p201_p11 = scmp.lt.s32.totalorder (!%p169_p10), %s1540_s15, 1  ;;  %s1550_s4 = smov (!%p169_p10), 4  }
  0x11   : > { %172 = sbr.rel (%p169_p10) target bundleno = 503 (0x1f7), region = 28  ;;  %s1551_s5 = smov (!%p169_p10), 8  }
  0x12   : > { %s1552_s6 = smov (!%p169_p10), 12   ;;  %s1553_s7 = smov (!%p169_p10), 24  }
  0x13   : > { %s1554_s8 = smov (!%p169_p10), 32   ;;  %s1951_s23 = sand.u32 (!%p169_p10), 1, %s1532_s13  }
  0x14   : > { %s1338_s28 = sshll.u32 (!%p169_p10), %s1540_s15, 9  ;;  %s1555_s9 = smov (!%p169_p10), [#allocation3]  }
  0x15   : > { %s1446_s10 = sshll.u32 (!%p169_p10), %s1555_s9, 4  ;;  %s1447_s10 = int_to_ptr.vmem [resolvable:$false] %s1446_s10 }
  0x16   : > { %s202_s26 = scalar_select %p201_p11, %s1540_s15, 1  ;;  %vm262_vm0 = vsmask.f32 3328  ;;  %vm263_vm1 = vsmask.f32 7440  ;;  %vm220_vm3 = vcmask 27648  }
  0x17   : > { %vm1660_vm2 = vmor %vm262_vm0, %vm263_vm1  ;;  %vm237_vm4 = vcmask 60448   ;;  %vm990_vm5 = vcmask 1041408   ;;  %vm401_vm6 = vcmask 93248   ;;  %vm450_vm7 = vcmask 126048   ;;  %s1448_s11 = scalar_lea.vmem %s1447_s10, 1024 }
  0x18   : > { %s1368_s27 = smul.u32 72, %s202_s26  ;;  %vm499_vm8 = vcmask 158848   ;;  %vm660_vm9 = vcmask 191648   ;;  %vm710_vm10 = vcmask 224448   ;;  %vm759_vm11 = vcmask 257248   ;;  %s1285_s26 = sshll.u32 %s1951_s23, 5 }
  0x19   : > { %vm920_vm12 = vcmask 290048   ;;  %vm977_vm13 = vcmask 293888   ;;  %vm1067_vm14 = vcmask 60416   ;;  %vm1076_vm15 = vcmask 64512  }
  0x1a   : > { %s1638_s30 = scalar_lea.vmem %s2061_s0, %s1368_s27  ;;  %s1954_s27 = scalar_lea.vmem [#allocation3], %s1285_s26 }
  0x1b   : > { %v411_v0 = vld [vmem:[%s1638_s30 + $0x8] sm:$0xf]  ;;  %v410_v1 = vld [vmem:[%s1638_s30] sm:$0xf]  ;;  %v413_v2 = vld [vmem:[%s1638_s30 + $0x18] sm:$0xf] }
  0x1c   : > { %428 = vrot.lane.b32.xlu1 %v411_v0, %s1550_s4  ;;  %426 = vrot.lane.b32.xlu0 %v410_v1, %s1550_s4  ;;  %v412_v3 = vld [vmem:[%s1638_s30 + $0x10] sm:$0xf]  ;;  %v251_v5 = vld [vmem:[%s1638_s30 + $0x14] sm:$0x1]  ;;  %s1151_s29 = sshll.u32 %s1954_s27, 4  ;;  %s1988_s29 = int_to_ptr.vmem [resolvable:$true] %s1151_s29 }
  0x1d   : > { %v250_v4 = vld [vmem:[%s1638_s30 + $0x10] sm:$0xf]  ;;  %v303_v8 = vshll.u32 %v251_v5, 16  ;;  %v246_v9 = vld [vmem:[%s1638_s30] sm:$0xf]  ;;  %p1449_p1 = scmp.lt.s32.totalorder %s1988_s29, %s1447_s10 }
  0x1e   : > { %v294_v6 = vshrl.u32 %v250_v4, 16  ;;  %v297_v7 = vshll.u32 %v250_v4, 16  ;;  %v460_v10 = vld [vmem:[%s1638_s30 + $0x8] sm:$0xf]  ;;  %v459_v11 = vld [vmem:[%s1638_s30] sm:$0xf] }
  0x1f   : > { %v247_v12 = vld [vmem:[%s1638_s30 + $0x4] sm:$0x1]  ;;  %v266_v13 = vshrl.u32 %v246_v9, 16  ;;  %v269_v14 = vshll.u32 %v246_v9, 16  ;;  %v252_v15 = vld [vmem:[%s1638_s30 + $0x18] sm:$0xf] }
  0x20   : > { %432 = vrot.lane.b32.xlu1 %v413_v2, %s1550_s4  ;;  %430 = vrot.lane.b32.xlu0 %v412_v3, %s1550_s4  ;;  %v296_v16 = vrot.slane %v294_v6, 4  ;;  %v299_v17 = vrot.slane %v297_v7, 5  ;;  %v305_v18 = vrot.slane %v303_v8, 5  ;;  %v275_v19 = vshll.u32 %v247_v12, 16  ;;  %v253_v20 = vld [vmem:[%s1638_s30 + $0x1c] sm:$0x1] }
  0x21   : > { %v268_v21 = vrot.slane %v266_v13, 4  ;;  %v271_v22 = vrot.slane %v269_v14, 5  ;;  %v308_v23 = vshrl.u32 %v252_v15, 16  ;;  %v311_v24 = vshll.u32 %v252_v15, 16  ;;  %v248_v25 = vld [vmem:[%s1638_s30 + $0x8] sm:$0xf] }
  0x22   : > { %v300_v26 = vor.u32 %v299_v17, %v296_v16  ;;  %v277_v27 = vrot.slane %v275_v19, 5  ;;  %v317_v28 = vshll.u32 %v253_v20, 16  ;;  %v249_v29 = vld [vmem:[%s1638_s30 + $0xc] sm:$0x1]  ;;  %v280_v30 = vshrl.u32 %v248_v25, 16 }
  0x23   : > { %v272_v32 = vor.u32 %v271_v22, %v268_v21  ;;  %v310_v33 = vrot.slane %v308_v23, 4  ;;  %v313_v34 = vrot.slane %v311_v24, 5  ;;  %v283_v35 = vshll.u32 %v248_v25, 16  ;;  %v510_v43 = vld [vmem:[%s1638_s30 + $0x8] sm:$0xf] }
  0x24   : > { %477 = vrot.lane.b32.xlu1 %v460_v10, %s1550_s4  ;;  %475 = vrot.lane.b32.xlu0 %v459_v11, %s1550_s4  ;;  %v301_v36 = vrot.slane %v300_v26, 4  ;;  %v319_v37 = vrot.slane %v317_v28, 5  ;;  %v282_v38 = vrot.slane %v280_v30, 4  ;;  %v289_v39 = vshll.u32 %v249_v29, 16  ;;  %v511_v44 = vld [vmem:[%s1638_s30 + $0xc] sm:$0x1] }
  0x25   : > { %v273_v40 = vrot.slane %v272_v32, 4  ;;  %v314_v41 = vor.u32 %v313_v34, %v310_v33  ;;  %v285_v42 = vrot.slane %v283_v35, 5  ;;  %v539_v47 = vshrl.u32 %v510_v43, 16  ;;  %v508_v49 = vld [vmem:[%s1638_s30] sm:$0xf] }
  0x26   : > { %v306_v45 = vsel %vm1660_vm2, %v301_v36, %v305_v18  ;;  %v291_v46 = vrot.slane %v289_v39, 5  ;;  %v542_v48 = vshll.u32 %v510_v43, 16  ;;  %v548_v53 = vshll.u32 %v511_v44, 16  ;;  %v509_v54 = vld [vmem:[%s1638_s30 + $0x4] sm:$0x1] }
  0x27   : > { %v278_v50 = vsel %vm1660_vm2, %v273_v40, %v277_v27  ;;  %v315_v51 = vrot.slane %v314_v41, 4  ;;  %v286_v52 = vor.u32 %v285_v42, %v282_v38  ;;  %v514_v55 = vld [vmem:[%s1638_s30 + $0x18] sm:$0xf]  ;;  %v541_v56 = vrot.slane %v539_v47, 4  ;;  %v515_v60 = vld [vmem:[%s1638_s30 + $0x1c] sm:$0x1] }
  0x28   : > { %381 = vrot.lane.b32.xlu1 %v306_v45, %s1551_s5  ;;  %377 = vrot.lane.b32.xlu0 %v278_v50, %s1551_s5  ;;  %v544_v57 = vrot.slane %v542_v48, 5  ;;  %v525_v58 = vshrl.u32 %v508_v49, 16  ;;  %v528_v59 = vshll.u32 %v508_v49, 16  ;;  %v534_v63 = vshll.u32 %v509_v54, 16  ;;  %v512_v0 = vld [vmem:[%s1638_s30 + $0x10] sm:$0xf] }
  0x29   : > { %v320_v61 = vsel %vm1660_vm2, %v315_v51, %v319_v37  ;;  %v287_v62 = vrot.slane %v286_v52, 4  ;;  %v567_v4 = vshrl.u32 %v514_v55, 16  ;;  %v513_v5 = vld [vmem:[%s1638_s30 + $0x14] sm:$0x1]  ;;  %v550_v7 = vrot.slane %v548_v53, 5 }
  0x2a   : > { %v545_v1 = vor.u32 %v544_v57, %v541_v56  ;;  %v527_v2 = vrot.slane %v525_v58, 4  ;;  %v530_v3 = vrot.slane %v528_v59, 5  ;;  %v570_v8 = vshll.u32 %v514_v55, 16  ;;  %v462_v10 = vld [vmem:[%s1638_s30 + $0x18] sm:$0xf] }
  0x2b   : > { %v292_v6 = vsel %vm1660_vm2, %v287_v62, %v291_v46  ;;  %v576_v9 = vshll.u32 %v515_v60, 16  ;;  %v569_v13 = vrot.slane %v567_v4, 4  ;;  %v553_v14 = vshrl.u32 %v512_v0, 16  ;;  %v461_v15 = vld [vmem:[%s1638_s30 + $0x10] sm:$0xf] }
  0x2c   : > { %383 = vrot.lane.b32.xlu1 %v320_v61, %s1551_s5  ;;  %379 = vrot.lane.b32.xlu0 %v292_v6, %s1551_s5  ;;  %v546_v11 = vrot.slane %v545_v1, 4  ;;  %v531_v12 = vor.u32 %v530_v3, %v527_v2  ;;  %v536_v16 = vrot.slane %v534_v63, 5  ;;  %v572_v17 = vrot.slane %v570_v8, 5  ;;  %v1306_v32 = vld [vmem:[%s1638_s30 + $0x10] sm:$0xf] }
  0x2d   : > { %v556_v18 = vshll.u32 %v512_v0, 16  ;;  %v562_v19 = vshll.u32 %v513_v5, 16  ;;  %v555_v21 = vrot.slane %v553_v14, 4  ;;  %v578_v25 = vrot.slane %v576_v9, 5  ;;  %v1304_v33 = vld [vmem:[%s1638_s30 + $0x8] sm:$0xf] }
  0x2e   : > { %v532_v20 = vrot.slane %v531_v12, 4  ;;  %v573_v22 = vor.u32 %v572_v17, %v569_v13  ;;  %v551_v24 = vsel %vm1660_vm2, %v546_v11, %v550_v7  ;;  %v799_v36 = vshrl.u32 %v1306_v32, 16  ;;  %v1310_v40 = vld [vmem:[%s1638_s30 + $0x20] sm:$0xf]  ;;  %v1308_v41 = vld [vmem:[%s1638_s30 + $0x18] sm:$0xf] }
  0x2f   : > { %v558_v23 = vrot.slane %v556_v18, 5  ;;  %v564_v29 = vrot.slane %v562_v19, 5  ;;  %v802_v37 = vshll.u32 %v1306_v32, 16  ;;  %v785_v38 = vshrl.u32 %v1304_v33, 16  ;;  %v1289_v42 = vld [vmem:[%s1638_s30 + $0x10] sm:$0xf] }
  0x30   : > { %481 = vrot.lane.b32.xlu1 %v462_v10, %s1550_s4  ;;  %479 = vrot.lane.b32.xlu0 %v461_v15, %s1550_s4  ;;  %v537_v26 = vsel %vm1660_vm2, %v532_v20, %v536_v16  ;;  %v574_v27 = vrot.slane %v573_v22, 4  ;;  %v788_v39 = vshll.u32 %v1304_v33, 16  ;;  %v1288_v43 = vld [vmem:[%s1638_s30 + $0x8] sm:$0xf]  ;;  %v1307_v44 = vld [vmem:[%s1638_s30 + $0x14] sm:$0x1] }
  0x31   : > { %v559_v28 = vor.u32 %v558_v23, %v555_v21  ;;  %v801_v45 = vrot.slane %v799_v36, 4  ;;  %v804_v46 = vrot.slane %v802_v37, 5  ;;  %v1305_v47 = vld [vmem:[%s1638_s30 + $0xc] sm:$0x1]  ;;  %v827_v48 = vshrl.u32 %v1310_v40, 16 }
  0x32   : > { %v579_v34 = vsel %vm1660_vm2, %v574_v27, %v578_v25  ;;  %v787_v49 = vrot.slane %v785_v38, 4  ;;  %v790_v50 = vrot.slane %v788_v39, 5  ;;  %v830_v51 = vshll.u32 %v1310_v40, 16  ;;  %v1291_v53 = vld [vmem:[%s1638_s30 + $0x20] sm:$0xf] }
  0x33   : > { %v560_v30 = vrot.slane %v559_v28, 4  ;;  %v813_v52 = vshrl.u32 %v1308_v41, 16  ;;  %v816_v54 = vshll.u32 %v1308_v41, 16  ;;  %v256_v55 = vld [vmem:[%s1638_s30 + $0x28] sm:$0xf]  ;;  %v808_v57 = vshll.u32 %v1307_v44, 16 }
  0x34   : > { %638 = vrot.lane.b32.xlu1 %v551_v24, %s1552_s6  ;;  %636 = vrot.lane.b32.xlu0 %v537_v26, %s1552_s6  ;;  %v1290_v56 = vld [vmem:[%s1638_s30 + $0x18] sm:$0xf]  ;;  %v794_v58 = vshll.u32 %v1305_v47, 16  ;;  %v254_v59 = vld [vmem:[%s1638_s30 + $0x20] sm:$0xf]  ;;  %v805_v60 = vor.u32 %v804_v46, %v801_v45  ;;  %v829_v61 = vrot.slane %v827_v48, 4  ;;  %v791_v62 = vor.u32 %v790_v50, %v787_v49 }
  0x35   : > { %v565_v35 = vsel %vm1660_vm2, %v560_v30, %v564_v29  ;;  %v1311_v63 = vld [vmem:[%s1638_s30 + $0x24] sm:$0x1]  ;;  %v832_v0 = vrot.slane %v830_v51, 5  ;;  %v815_v1 = vrot.slane %v813_v52, 4  ;;  %v336_v2 = vshrl.u32 %v256_v55, 16 }
  0x36   : > { %v1309_v3 = vld [vmem:[%s1638_s30 + $0x1c] sm:$0x1]  ;;  %v818_v4 = vrot.slane %v816_v54, 5  ;;  %v339_v5 = vshll.u32 %v256_v55, 16  ;;  %v322_v6 = vshrl.u32 %v254_v59, 16  ;;  %v325_v7 = vshll.u32 %v254_v59, 16 }
  0x37   : > { %v1297_v8 = vld [vmem:[%s1638_s30 + $0x10] sm:$0xf]  ;;  %v1296_v9 = vld [vmem:[%s1638_s30 + $0x8] sm:$0xf]  ;;  %v810_v10 = vrot.slane %v808_v57, 5  ;;  %v796_v11 = vrot.slane %v794_v58, 5  ;;  %v833_v19 = vor.u32 %v832_v0, %v829_v61 }
  0x38   : > { %642 = vrot.lane.b32.xlu1 %v579_v34, %s1552_s6  ;;  %640 = vrot.lane.b32.xlu0 %v565_v35, %s1552_s6  ;;  %v806_v12 = vrot.slane %v805_v60, 4  ;;  %v836_v13 = vshll.u32 %v1311_v63, 16  ;;  %v260_v14 = vld [vmem:[%s1638_s30 + $0x38] sm:$0xf]  ;;  %v258_v15 = vld [vmem:[%s1638_s30 + $0x30] sm:$0xf]  ;;  %v819_v22 = vor.u32 %v818_v4, %v815_v1 }
  0x39   : > { %v1299_v16 = vld [vmem:[%s1638_s30 + $0x20] sm:$0xf]  ;;  %v1298_v17 = vld [vmem:[%s1638_s30 + $0x18] sm:$0xf]  ;;  %v792_v18 = vrot.slane %v791_v62, 4  ;;  %v822_v20 = vshll.u32 %v1309_v3, 16 }
  0x3a   : > { %v338_v21 = vrot.slane %v336_v2, 4  ;;  %v257_v23 = vld [vmem:[%s1638_s30 + $0x2c] sm:$0x1]  ;;  %v341_v24 = vrot.slane %v339_v5, 5  ;;  %v324_v25 = vrot.slane %v322_v6, 4  ;;  %v327_v26 = vrot.slane %v325_v7, 5 }
  0x3b   : > { %v255_v27 = vld [vmem:[%s1638_s30 + $0x24] sm:$0x1]  ;;  %v364_v28 = vshrl.u32 %v260_v14, 16  ;;  %v367_v29 = vshll.u32 %v260_v14, 16  ;;  %v350_v30 = vshrl.u32 %v258_v15, 16  ;;  %v353_v32 = vshll.u32 %v258_v15, 16 }
  0x3c   : > { %688 = vrot.lane.b32.xlu1 %v1289_v42, %s1553_s7  ;;  %686 = vrot.lane.b32.xlu0 %v1288_v43, %s1553_s7  ;;  %v811_v33 = vsel %vm1660_vm2, %v806_v12, %v810_v10  ;;  %v838_v34 = vrot.slane %v836_v13, 5  ;;  %v797_v35 = vsel %vm1660_vm2, %v792_v18, %v796_v11  ;;  %v834_v36 = vrot.slane %v833_v19, 4  ;;  %v261_v43 = vld [vmem:[%s1638_s30 + $0x3c] sm:$0x1]  ;;  %v259_v48 = vld [vmem:[%s1638_s30 + $0x34] sm:$0x1] }
  0x3d   : > { %v824_v37 = vrot.slane %v822_v20, 5  ;;  %v345_v38 = vshll.u32 %v257_v23, 16  ;;  %v820_v39 = vrot.slane %v819_v22, 4  ;;  %v342_v40 = vor.u32 %v341_v24, %v338_v21  ;;  %v518_v61 = vld [vmem:[%s1638_s30 + $0x28] sm:$0xf] }
  0x3e   : > { %v328_v41 = vor.u32 %v327_v26, %v324_v25  ;;  %v331_v42 = vshll.u32 %v255_v27, 16  ;;  %v366_v44 = vrot.slane %v364_v28, 4  ;;  %v369_v45 = vrot.slane %v367_v29, 5  ;;  %v516_v2 = vld [vmem:[%s1638_s30 + $0x20] sm:$0xf]  ;;  %v1436_v25 = vld [vmem:[%s2062_s1 + $0x8] sm:$0xff]  }
  0x3f   : > { %v352_v46 = vrot.slane %v350_v30, 4  ;;  %v355_v47 = vrot.slane %v353_v32, 5  ;;  %v839_v49 = vsel %vm1660_vm2, %v834_v36, %v838_v34  ;;  %v347_v50 = vrot.slane %v345_v38, 5  ;;  %v231_v11 = vld [vmem:[%s1638_s30 + $0x10] sm:$0xf] }
  0x40   : > { %692 = vrot.lane.b32.xlu1 %v1291_v53, %s1553_s7  ;;  %690 = vrot.lane.b32.xlu0 %v1290_v56, %s1553_s7  ;;  %v825_v51 = vsel %vm1660_vm2, %v820_v39, %v824_v37  ;;  %v343_v52 = vrot.slane %v342_v40, 4  ;;  %v333_v53 = vrot.slane %v331_v42, 5  ;;  %v373_v54 = vshll.u32 %v261_v43, 16  ;;  %v415_v12 = vld [vmem:[%s1638_s30 + $0x28] sm:$0xf] }
  0x41   : > { %v329_v55 = vrot.slane %v328_v41, 4  ;;  %v370_v56 = vor.u32 %v369_v45, %v366_v44  ;;  %v356_v57 = vor.u32 %v355_v47, %v352_v46  ;;  %v359_v58 = vshll.u32 %v259_v48, 16  ;;  %v414_v13 = vld [vmem:[%s1638_s30 + $0x20] sm:$0xf]  ;;  %v520_v19 = vld [vmem:[%s1638_s30 + $0x30] sm:$0xf] }
  0x42   : > { %v348_v59 = vsel %vm1660_vm2, %v343_v52, %v347_v50  ;;  %v375_v60 = vrot.slane %v373_v54, 5  ;;  %v595_v3 = vshrl.u32 %v518_v61, 16  ;;  %v598_v4 = vshll.u32 %v518_v61, 16  ;;  %v212_v15 = vld [vmem:[%s1638_s30] sm:$0xf] }
  0x43   : > { %v334_v62 = vsel %vm1660_vm2, %v329_v55, %v333_v53  ;;  %v371_v63 = vrot.slane %v370_v56, 4  ;;  %v357_v0 = vrot.slane %v356_v57, 4  ;;  %v361_v1 = vrot.slane %v359_v58, 5  ;;  %221 = vst.msk [vmem:[#allocation2] sm:$0xf] %vm220_vm3, %v212_v15  ;;  %v1437_v46 = vld [vmem:[%s2062_s1] sm:$0xff]  }
  0x44   : > { %737 = vrot.lane.b32.xlu1 %v1297_v8, %s1553_s7  ;;  %735 = vrot.lane.b32.xlu0 %v1296_v9, %s1553_s7  ;;  %v581_v7 = vshrl.u32 %v516_v2, 16  ;;  %v1759_v8 = vld [vmem:[%s1638_s30 + $0x38] sm:$0xf]  ;;  %v214_v9 = vld [vmem:[%s1638_s30 + $0x10] sm:$0xf]  ;;  %v584_v10 = vshll.u32 %v516_v2, 16 }
  0x45   : > { %v376_v5 = vsel %vm1660_vm2, %v371_v63, %v375_v60  ;;  %v362_v6 = vsel %vm1660_vm2, %v357_v0, %v361_v1  ;;  %223 = vst.msk [vmem:[#allocation2 + $0x8] sm:$0xf] %vm220_vm3, %v214_v9  ;;  %v1766_v14 = vrot.slane %v595_v3, 4  ;;  %v623_v18 = vshrl.u32 %v1759_v8, 16  ;;  %v215_v20 = vld [vmem:[%s1638_s30 + $0x18] sm:$0xf] }
  0x46   : > { %240 = vst.msk [vmem:[#allocation2 + $0x8] sm:$0xf] %vm237_vm4, %v231_v11  ;;  %v232_v21 = vld [vmem:[%s1638_s30 + $0x18] sm:$0xf]  ;;  %v1780_v22 = vrot.slane %v581_v7, 4  ;;  %v1789_v26 = vrot.slane %v584_v10, 5 }
  0x47   : > { %224 = vst.msk [vmem:[#allocation2 + $0xc] sm:$0xf] %vm220_vm3, %v215_v20  ;;  %v213_v23 = vld [vmem:[%s1638_s30 + $0x8] sm:$0xf]  ;;  %v417_v29 = vld [vmem:[%s1638_s30 + $0x38] sm:$0xf] }
  0x48   : > { %741 = vrot.lane.b32.xlu1 %v1299_v16, %s1553_s7  ;;  %739 = vrot.lane.b32.xlu0 %v1298_v17, %s1553_s7  ;;  %v229_v16 = vld [vmem:[%s1638_s30] sm:$0xf]  ;;  %v1773_v17 = vrot.slane %v598_v4, 5  ;;  %v230_v24 = vld [vmem:[%s1638_s30 + $0x8] sm:$0xf]  ;;  %v626_v37 = vshll.u32 %v1759_v8, 16  ;;  %v587_v52 = vor.u32 %v1789_v26, %v1780_v22 }
  0x49   : > { %238 = vst.msk [vmem:[#allocation2] sm:$0xf] %vm237_vm4, %v229_v16  ;;  %241 = vst.msk [vmem:[#allocation2 + $0xc] sm:$0xf] %vm237_vm4, %v232_v21  ;;  %v217_v28 = vld [vmem:[%s1638_s30 + $0x28] sm:$0xf] }
  0x4a   : > { %222 = vst.msk [vmem:[#allocation2 + $0x4] sm:$0xf] %vm220_vm3, %v213_v23  ;;  %v1435_v27 = vld [vmem:[%s2062_s1 + $0x10] ss:$0 sps:$4 sm:$0x33]   ;;  %v609_v41 = vshrl.u32 %v520_v19, 16  ;;  %v601_v48 = vor.u32 %v1773_v17, %v1766_v14 }
  0x4b   : > { %v416_v30 = vld [vmem:[%s1638_s30 + $0x30] sm:$0xf]  ;;  %v519_v32 = vld [vmem:[%s1638_s30 + $0x2c] sm:$0x1]  ;;  %239 = vst.msk [vmem:[#allocation2 + $0x4] sm:$0xf] %vm237_vm4, %v230_v24  ;;  %1366 = vmatprep.subr.msk.bf16.mxu0 %vm990_vm5, %v1435_v27  ;;  %1367 = vmatprep.subr.msk.bf16.mxu1 %vm990_vm5, %v1435_v27 }
  0x4c   : > { %898 = vrot.lane.b32.xlu1 %v811_v33, %s1554_s8  ;;  %896 = vrot.lane.b32.xlu0 %v797_v35, %s1554_s8  ;;  %v517_v33 = vld [vmem:[%s1638_s30 + $0x24] sm:$0x1]  ;;  %226 = vst.msk [vmem:[#allocation2 + $0x14] sm:$0xf] %vm220_vm3, %v217_v28  ;;  %v234_v34 = vld [vmem:[%s1638_s30 + $0x28] sm:$0xf] }
  0x4d   : > { %v216_v35 = vld [vmem:[%s1638_s30 + $0x20] sm:$0xf]  ;;  %v992_v38 = vsel %vm990_vm5, %v1435_v27, 0  ;;  %243 = vst.msk [vmem:[#allocation2 + $0x14] sm:$0xf] %vm237_vm4, %v234_v34  ;;  %v612_v42 = vshll.u32 %v520_v19, 16 }
  0x4e   : > { %v233_v36 = vld [vmem:[%s1638_s30 + $0x20] sm:$0xf]  ;;  %225 = vst.msk [vmem:[#allocation2 + $0x10] sm:$0xf] %vm220_vm3, %v216_v35  ;;  %v219_v39 = vld [vmem:[%s1638_s30 + $0x38] sm:$0xf]  ;;  %1347 = vmatpush3.bf16.msra.mxu0 %v992_v38  ;;  %1363 = vmatpush3.bf16.msra.mxu1 %v992_v38 }
  0x4f   : > { %v236_v40 = vld [vmem:[%s1638_s30 + $0x38] sm:$0xf]  ;;  %242 = vst.msk [vmem:[#allocation2 + $0x10] sm:$0xf] %vm237_vm4, %v233_v36  ;;  %v218_v43 = vld [vmem:[%s1638_s30 + $0x30] sm:$0xf]  ;;  %1348 = vmatprep.subr.bf16.mxu0 %v1436_v25  ;;  %1361 = vmatprep.subr.bf16.mxu1 %v1436_v25 }
  0x50   : > { %902 = vrot.lane.b32.xlu1 %v839_v49, %s1554_s8  ;;  %900 = vrot.lane.b32.xlu0 %v825_v51, %s1554_s8  ;;  %228 = vst.msk [vmem:[#allocation2 + $0x1c] sm:$0xf] %vm220_vm3, %v219_v39  ;;  %v235_v44 = vld [vmem:[%s1638_s30 + $0x30] sm:$0xf]  ;;  %227 = vst.msk [vmem:[#allocation2 + $0x18] sm:$0xf] %vm220_vm3, %v218_v43 }
  0x51   : > { %245 = vst.msk [vmem:[#allocation2 + $0x1c] sm:$0xf] %vm237_vm4, %v236_v40  ;;  %v464_v45 = vld [vmem:[%s1638_s30 + $0x28] sm:$0xf]  ;;  %244 = vst.msk [vmem:[#allocation2 + $0x18] sm:$0xf] %vm237_vm4, %v235_v44 }
  0x52   : > { %v463_v47 = vld [vmem:[%s1638_s30 + $0x20] sm:$0xf]  ;;  %v604_v49 = vshll.u32 %v519_v32, 16  ;;  %v590_v50 = vshll.u32 %v517_v33, 16  ;;  %v625_v51 = vrot.slane %v623_v18, 4  ;;  %v628_v54 = vrot.slane %v626_v37, 5  ;;  %1349 = vmatpush3.bf16.msra.mxu0 %v1436_v25  ;;  %1364 = vmatpush3.bf16.msra.mxu1 %v1436_v25 }
  0x53   : > { %v523_v53 = vld [vmem:[%s1638_s30 + $0x3c] sm:$0x1]  ;;  %v611_v55 = vrot.slane %v609_v41, 4  ;;  %v614_v56 = vrot.slane %v612_v42, 5  ;;  %v521_v57 = vld [vmem:[%s1638_s30 + $0x34] sm:$0x1]  ;;  %1350 = vmatprep.subr.bf16.mxu0 %v1437_v46  ;;  %1362 = vmatprep.subr.bf16.mxu1 %v1437_v46 }
  0x54   : > { %387 = vrot.lane.b32.xlu1 %v348_v59, %s1551_s5  ;;  %385 = vrot.lane.b32.xlu0 %v334_v62, %s1551_s5  ;;  %v602_v58 = vrot.slane %v601_v48, 4  ;;  %v606_v59 = vrot.slane %v604_v49, 5  ;;  %v592_v60 = vrot.slane %v590_v50, 5  ;;  %v632_v61 = vshll.u32 %v523_v53, 16  ;;  %v466_v62 = vld [vmem:[%s1638_s30 + $0x38] sm:$0xf] }
  0x55   : > { %v465_v63 = vld [vmem:[%s1638_s30 + $0x30] sm:$0xf]  ;;  %v588_v0 = vrot.slane %v587_v52, 4  ;;  %v629_v1 = vor.u32 %v628_v54, %v625_v51  ;;  %v615_v2 = vor.u32 %v614_v56, %v611_v55  ;;  %v618_v3 = vshll.u32 %v521_v57, 16  ;;  %v1292_v19 = vld [vmem:[%s1638_s30 + $0x28] sm:$0xf] }
  0x56   : > { %1351 = vmatpush3.bf16.msra.mxu0 %v1437_v46  ;;  %1365 = vmatpush3.bf16.msra.mxu1 %v1437_v46  ;;  %v607_v4 = vsel %vm1660_vm2, %v602_v58, %v606_v59  ;;  %v1293_v18 = vld [vmem:[%s1638_s30 + $0x30] sm:$0xf]  ;;  %v1318_v20 = vld [vmem:[%s1638_s30 + $0x40] sm:$0xf]  ;;  %v1316_v21 = vld [vmem:[%s1638_s30 + $0x38] sm:$0xf] }
  0x57   : > { %v630_v7 = vrot.slane %v629_v1, 4  ;;  %v616_v8 = vrot.slane %v615_v2, 4  ;;  %v620_v9 = vrot.slane %v618_v3, 5  ;;  %v1295_v22 = vld [vmem:[%s1638_s30 + $0x40] sm:$0xf]  ;;  %v886_v32 = vshll.u32 %v1318_v20, 16 }
  0x58   : > { %391 = vrot.lane.b32.xlu1 %v376_v5, %s1551_s5  ;;  %389 = vrot.lane.b32.xlu0 %v362_v6, %s1551_s5  ;;  %v634_v5 = vrot.slane %v632_v61, 5  ;;  %v593_v6 = vsel %vm1660_vm2, %v588_v0, %v592_v60  ;;  %v1294_v23 = vld [vmem:[%s1638_s30 + $0x38] sm:$0xf]  ;;  %v1315_v24 = vld [vmem:[%s1638_s30 + $0x34] sm:$0x1]  ;;  %v869_v33 = vshrl.u32 %v1316_v21, 16 }
  0x59   : > { %v621_v11 = vsel %vm1660_vm2, %v616_v8, %v620_v9  ;;  %v872_v34 = vshll.u32 %v1316_v21, 16  ;;  %v1301_v35 = vld [vmem:[%s1638_s30 + $0x30] sm:$0xf]  ;;  %v1300_v36 = vld [vmem:[%s1638_s30 + $0x28] sm:$0xf]  ;;  %v864_v38 = vshll.u32 %v1315_v24, 16 }
  0x5a   : > { %v635_v10 = vsel %vm1660_vm2, %v630_v7, %v634_v5  ;;  %v1319_v41 = vld [vmem:[%s1638_s30 + $0x44] sm:$0x1]  ;;  %v888_v43 = vrot.slane %v886_v32, 5  ;;  %v871_v44 = vrot.slane %v869_v33, 4  ;;  %v1317_v46 = vld [vmem:[%s1638_s30 + $0x3c] sm:$0x1] }
  0x5b   : > { %v866_v48 = vrot.slane %v864_v38, 5  ;;  %v892_v50 = vshll.u32 %v1319_v41, 16  ;;  %v1303_v51 = vld [vmem:[%s1638_s30 + $0x40] sm:$0xf]  ;;  %v1302_v52 = vld [vmem:[%s1638_s30 + $0x38] sm:$0xf] }
  0x5c   : > { %436 = vrot.lane.b32.xlu1 %v415_v12, %s1550_s4  ;;  %434 = vrot.lane.b32.xlu0 %v414_v13, %s1550_s4  ;;  %v1314_v12 = vld [vmem:[%s1638_s30 + $0x30] sm:$0xf]  ;;  %v1312_v13 = vld [vmem:[%s1638_s30 + $0x28] sm:$0xf]  ;;  %v878_v56 = vshll.u32 %v1317_v46, 16 }
  0x5d   : > { %v855_v14 = vshrl.u32 %v1314_v12, 16  ;;  %v858_v15 = vshll.u32 %v1314_v12, 16  ;;  %v841_v16 = vshrl.u32 %v1312_v13, 16  ;;  %v844_v17 = vshll.u32 %v1312_v13, 16 }
  0x5e   : > { %v894_v58 = vrot.slane %v892_v50, 5 }
  0x5f   : > { %v857_v25 = vrot.slane %v855_v14, 4  ;;  %v860_v26 = vrot.slane %v858_v15, 5  ;;  %v843_v27 = vrot.slane %v841_v16, 4  ;;  %v846_v28 = vrot.slane %v844_v17, 5 }
  0x60   : > { %440 = vrot.lane.b32.xlu1 %v417_v29, %s1550_s4  ;;  %438 = vrot.lane.b32.xlu0 %v416_v30, %s1550_s4  ;;  %v1313_v29 = vld [vmem:[%s1638_s30 + $0x2c] sm:$0x1]  ;;  %v883_v30 = vshrl.u32 %v1318_v20, 16 }
  0x61   : > { %v861_v37 = vor.u32 %v860_v26, %v857_v25  ;;  %v847_v39 = vor.u32 %v846_v28, %v843_v27  ;;  %v850_v40 = vshll.u32 %v1313_v29, 16 }
  0x62   : > { %v885_v42 = vrot.slane %v883_v30, 4 }
  0x63   : > { %v852_v49 = vrot.slane %v850_v40, 5  ;;  %v848_v53 = vrot.slane %v847_v39, 4 }
  0x64   : > { %485 = vrot.lane.b32.xlu1 %v464_v45, %s1550_s4  ;;  %483 = vrot.lane.b32.xlu0 %v463_v47, %s1550_s4  ;;  %v874_v45 = vrot.slane %v872_v34, 5  ;;  %v862_v47 = vrot.slane %v861_v37, 4  ;;  %v889_v54 = vor.u32 %v888_v43, %v885_v42 }
  0x65   : > { %v853_v59 = vsel %vm1660_vm2, %v848_v53, %v852_v49 }
  0x66   : > { %v875_v55 = vor.u32 %v874_v45, %v871_v44  ;;  %v867_v57 = vsel %vm1660_vm2, %v862_v47, %v866_v48  ;;  %v890_v60 = vrot.slane %v889_v54, 4 }
  0x68   : > { %489 = vrot.lane.b32.xlu1 %v466_v62, %s1550_s4  ;;  %487 = vrot.lane.b32.xlu0 %v465_v63, %s1550_s4  ;;  %v876_v61 = vrot.slane %v875_v55, 4  ;;  %v880_v62 = vrot.slane %v878_v56, 5  ;;  %v895_v63 = vsel %vm1660_vm2, %v890_v60, %v894_v58 }
  0x6a   : > { %v881_v0 = vsel %vm1660_vm2, %v876_v61, %v880_v62 }
  0x6c   : > { %646 = vrot.lane.b32.xlu1 %v607_v4, %s1552_s6  ;;  %644 = vrot.lane.b32.xlu0 %v593_v6, %s1552_s6 }
  0x70   : > { %650 = vrot.lane.b32.xlu1 %v635_v10, %s1552_s6  ;;  %648 = vrot.lane.b32.xlu0 %v621_v11, %s1552_s6  ;;  %s1983_s6 = scalar_lea.hbm %s2063_s2, %s1338_s28 }
  0x74   : > { %696 = vrot.lane.b32.xlu1 %v1293_v18, %s1553_s7  ;;  %694 = vrot.lane.b32.xlu0 %v1292_v19, %s1553_s7 }
  0x78   : > { %700 = vrot.lane.b32.xlu1 %v1295_v22, %s1553_s7  ;;  %698 = vrot.lane.b32.xlu0 %v1294_v23, %s1553_s7 }
  0x7c   : > { %745 = vrot.lane.b32.xlu1 %v1301_v35, %s1553_s7  ;;  %743 = vrot.lane.b32.xlu0 %v1300_v36, %s1553_s7 }
  0x80   : > { %749 = vrot.lane.b32.xlu1 %v1303_v51, %s1553_s7  ;;  %747 = vrot.lane.b32.xlu0 %v1302_v52, %s1553_s7  ;;  %s1131_s7 = scalar_lea.sflag [#allocation4], %s1951_s23 }
  0x84   : > { %906 = vrot.lane.b32.xlu1 %v867_v57, %s1554_s8  ;;  %904 = vrot.lane.b32.xlu0 %v853_v59, %s1554_s8 }
  0x88   : > { %910 = vrot.lane.b32.xlu1 %v895_v63, %s1554_s8  ;;  %908 = vrot.lane.b32.xlu0 %v881_v0, %s1554_s8  ;;  %s1442_s8 = scalar_lea.vmem %s1988_s29, 512 }
  0x89   : > { %p1443_p12 = scmp.ne.s32.totalorder %s1988_s29, %s1442_s8  ;;  %p1450_p2 = scmp.lt.s32.totalorder %s1448_s11, %s1442_s8 }
  0x8b   : > { %p1444_p13 = pnand %p1443_p12, %p1618_p4  ;;  %p1451_p3 = por %p1450_p2, %p1449_p1 }
  0x8d   : > { %p1445_p0 = pneg %p1444_p13 }
  0x8e   : > { %v429_v1 = vpop.permute.xlu1 %428  ;;  %v427_v2 = vpop.permute.xlu0 %426 }
  0x8f   : > { %p1452_p5 = pnand %p1451_p3, %p1445_p0 }
  0x92   : > { %v433_v3 = vpop.permute.xlu1 %432  ;;  %v431_v4 = vpop.permute.xlu0 %430 }
  0x96   : > { %v478_v5 = vpop.permute.xlu1 %477  ;;  %v476_v6 = vpop.permute.xlu0 %475 }
  0x9a   : > { %v382_v7 = vpop.permute.xlu1 %381  ;;  %v378_v8 = vpop.permute.xlu0 %377 }
  0x9b   : > { %404 = vst.msk [vmem:[#allocation2 + $0x8] sm:$0xf] %vm401_vm6, %v382_v7  ;;  %402 = vst.msk [vmem:[#allocation2] sm:$0xf] %vm401_vm6, %v378_v8 }
  0x9c   : > { %451 = vst.msk [vmem:[#allocation2] sm:$0xf] %vm450_vm7, %v427_v2  ;;  %453 = vst.msk [vmem:[#allocation2 + $0x8] sm:$0xf] %vm450_vm7, %v431_v4 }
  0x9d   : > { %500 = vst.msk [vmem:[#allocation2] sm:$0xf] %vm499_vm8, %v476_v6 }
  0x9e   : > { %v384_v31 = vpop.permute.xlu1 %383  ;;  %v380_v9 = vpop.permute.xlu0 %379 }
  0x9f   : > { %405 = vst.msk [vmem:[#allocation2 + $0xc] sm:$0xf] %vm401_vm6, %v384_v31  ;;  %403 = vst.msk [vmem:[#allocation2 + $0x4] sm:$0xf] %vm401_vm6, %v380_v9 }
  0xa0   : > { %454 = vst.msk [vmem:[#allocation2 + $0xc] sm:$0xf] %vm450_vm7, %v433_v3  ;;  %452 = vst.msk [vmem:[#allocation2 + $0x4] sm:$0xf] %vm450_vm7, %v429_v1 }
  0xa1   : > { %501 = vst.msk [vmem:[#allocation2 + $0x4] sm:$0xf] %vm499_vm8, %v478_v5 }
  0xa2   : > { %v482_v10 = vpop.permute.xlu1 %481  ;;  %v480_v11 = vpop.permute.xlu0 %479 }
  0xa3   : > { %503 = vst.msk [vmem:[#allocation2 + $0xc] sm:$0xf] %vm499_vm8, %v482_v10  ;;  %502 = vst.msk [vmem:[#allocation2 + $0x8] sm:$0xf] %vm499_vm8, %v480_v11 }
  0xa6   : > { %v639_v12 = vpop.permute.xlu1 %638  ;;  %v637_v13 = vpop.permute.xlu0 %636 }
  0xa7   : > { %662 = vst.msk [vmem:[#allocation2 + $0x4] sm:$0xf] %vm660_vm9, %v639_v12  ;;  %661 = vst.msk [vmem:[#allocation2] sm:$0xf] %vm660_vm9, %v637_v13 }
  0xaa   : > { %v643_v14 = vpop.permute.xlu1 %642  ;;  %v641_v15 = vpop.permute.xlu0 %640 }
  0xab   : > { %664 = vst.msk [vmem:[#allocation2 + $0xc] sm:$0xf] %vm660_vm9, %v643_v14  ;;  %663 = vst.msk [vmem:[#allocation2 + $0x8] sm:$0xf] %vm660_vm9, %v641_v15 }
  0xae   : > { %v689_v16 = vpop.permute.xlu1 %688  ;;  %v687_v17 = vpop.permute.xlu0 %686 }
  0xaf   : > { %712 = vst.msk [vmem:[#allocation2 + $0x4] sm:$0xf] %vm710_vm10, %v689_v16  ;;  %711 = vst.msk [vmem:[#allocation2] sm:$0xf] %vm710_vm10, %v687_v17 }
  0xb2   : > { %v693_v18 = vpop.permute.xlu1 %692  ;;  %v691_v19 = vpop.permute.xlu0 %690 }
  0xb3   : > { %714 = vst.msk [vmem:[#allocation2 + $0xc] sm:$0xf] %vm710_vm10, %v693_v18  ;;  %713 = vst.msk [vmem:[#allocation2 + $0x8] sm:$0xf] %vm710_vm10, %v691_v19 }
  0xb6   : > { %v738_v20 = vpop.permute.xlu1 %737  ;;  %v736_v21 = vpop.permute.xlu0 %735 }
  0xb7   : > { %761 = vst.msk [vmem:[#allocation2 + $0x4] sm:$0xf] %vm759_vm11, %v738_v20  ;;  %760 = vst.msk [vmem:[#allocation2] sm:$0xf] %vm759_vm11, %v736_v21 }
  0xba   : > { %v742_v22 = vpop.permute.xlu1 %741  ;;  %v740_v23 = vpop.permute.xlu0 %739 }
  0xbb   : > { %763 = vst.msk [vmem:[#allocation2 + $0xc] sm:$0xf] %vm759_vm11, %v742_v22  ;;  %762 = vst.msk [vmem:[#allocation2 + $0x8] sm:$0xf] %vm759_vm11, %v740_v23 }
  0xbe   : > { %v899_v24 = vpop.permute.xlu1 %898  ;;  %v897_v25 = vpop.permute.xlu0 %896 }
  0xbf   : > { %922 = vst.msk [vmem:[#allocation2 + $0x4] sm:$0xf] %vm920_vm12, %v899_v24  ;;  %921 = vst.msk [vmem:[#allocation2] sm:$0xf] %vm920_vm12, %v897_v25 }
  0xc2   : > { %v903_v26 = vpop.permute.xlu1 %902  ;;  %v901_v27 = vpop.permute.xlu0 %900 }
  0xc3   : > { %924 = vst.msk [vmem:[#allocation2 + $0xc] sm:$0xf] %vm920_vm12, %v903_v26  ;;  %923 = vst.msk [vmem:[#allocation2 + $0x8] sm:$0xf] %vm920_vm12, %v901_v27 }
  0xc6   : > { %v388_v28 = vpop.permute.xlu1 %387  ;;  %v386_v29 = vpop.permute.xlu0 %385  ;;  %v1438_v30 = vld [vmem:[#allocation2] sm:$0xff]  }
  0xc7   : > { %407 = vst.msk [vmem:[#allocation2 + $0x14] sm:$0xf] %vm401_vm6, %v388_v28  ;;  %406 = vst.msk [vmem:[#allocation2 + $0x10] sm:$0xf] %vm401_vm6, %v386_v29  ;;  %1352 = vmatprep.mubr.msk.bf16.mxu0 %vm977_vm13, %v1438_v30 }
  0xca   : > { %v392_v32 = vpop.permute.xlu1 %391  ;;  %v390_v33 = vpop.permute.xlu0 %389  ;;  %v1439_v34 = vld [vmem:[#allocation2 + $0x8] sm:$0xff]  }
  0xcb   : > { %409 = vst.msk [vmem:[#allocation2 + $0x1c] sm:$0xf] %vm401_vm6, %v392_v32  ;;  %408 = vst.msk [vmem:[#allocation2 + $0x18] sm:$0xf] %vm401_vm6, %v390_v33  ;;  %1353 = vmatmul.mubr.msk.bf16.vlgmr.msra.gmra.mxu0 %vm977_vm13, %v1439_v34 }
  0xce   : > { %v437_v35 = vpop.permute.xlu1 %436  ;;  %v435_v36 = vpop.permute.xlu0 %434 }
  0xcf   : > { %456 = vst.msk [vmem:[#allocation2 + $0x14] sm:$0xf] %vm450_vm7, %v437_v35  ;;  %455 = vst.msk [vmem:[#allocation2 + $0x10] sm:$0xf] %vm450_vm7, %v435_v36 }
  0xd2   : > { %v441_v37 = vpop.permute.xlu1 %440  ;;  %v439_v38 = vpop.permute.xlu0 %438 }
  0xd3   : > { %458 = vst.msk [vmem:[#allocation2 + $0x1c] sm:$0xf] %vm450_vm7, %v441_v37  ;;  %457 = vst.msk [vmem:[#allocation2 + $0x18] sm:$0xf] %vm450_vm7, %v439_v38 }
  0xd6   : > { %v486_v39 = vpop.permute.xlu1 %485  ;;  %v484_v40 = vpop.permute.xlu0 %483 }
  0xd7   : > { %505 = vst.msk [vmem:[#allocation2 + $0x14] sm:$0xf] %vm499_vm8, %v486_v39  ;;  %504 = vst.msk [vmem:[#allocation2 + $0x10] sm:$0xf] %vm499_vm8, %v484_v40 }
  0xda   : > { %v490_v41 = vpop.permute.xlu1 %489  ;;  %v488_v42 = vpop.permute.xlu0 %487 }
  0xdb   : > { %507 = vst.msk [vmem:[#allocation2 + $0x1c] sm:$0xf] %vm499_vm8, %v490_v41  ;;  %506 = vst.msk [vmem:[#allocation2 + $0x18] sm:$0xf] %vm499_vm8, %v488_v42 }
  0xde   : > { %v647_v43 = vpop.permute.xlu1 %646  ;;  %v645_v44 = vpop.permute.xlu0 %644 }
  0xdf   : > { %666 = vst.msk [vmem:[#allocation2 + $0x14] sm:$0xf] %vm660_vm9, %v647_v43  ;;  %665 = vst.msk [vmem:[#allocation2 + $0x10] sm:$0xf] %vm660_vm9, %v645_v44 }
  0xe2   : > { %v651_v45 = vpop.permute.xlu1 %650  ;;  %v649_v46 = vpop.permute.xlu0 %648 }
  0xe3   : > { %668 = vst.msk [vmem:[#allocation2 + $0x1c] sm:$0xf] %vm660_vm9, %v651_v45  ;;  %667 = vst.msk [vmem:[#allocation2 + $0x18] sm:$0xf] %vm660_vm9, %v649_v46 }
  0xe6   : > { %v697_v47 = vpop.permute.xlu1 %696  ;;  %v695_v48 = vpop.permute.xlu0 %694 }
  0xe7   : > { %716 = vst.msk [vmem:[#allocation2 + $0x14] sm:$0xf] %vm710_vm10, %v697_v47  ;;  %715 = vst.msk [vmem:[#allocation2 + $0x10] sm:$0xf] %vm710_vm10, %v695_v48 }
  0xea   : > { %v701_v49 = vpop.permute.xlu1 %700  ;;  %v699_v50 = vpop.permute.xlu0 %698 }
  0xeb   : > { %718 = vst.msk [vmem:[#allocation2 + $0x1c] sm:$0xf] %vm710_vm10, %v701_v49  ;;  %717 = vst.msk [vmem:[#allocation2 + $0x18] sm:$0xf] %vm710_vm10, %v699_v50 }
  0xee   : > { %v746_v51 = vpop.permute.xlu1 %745  ;;  %v744_v52 = vpop.permute.xlu0 %743 }
  0xef   : > { %765 = vst.msk [vmem:[#allocation2 + $0x14] sm:$0xf] %vm759_vm11, %v746_v51  ;;  %764 = vst.msk [vmem:[#allocation2 + $0x10] sm:$0xf] %vm759_vm11, %v744_v52 }
  0xf2   : > { %v750_v53 = vpop.permute.xlu1 %749  ;;  %v748_v54 = vpop.permute.xlu0 %747 }
  0xf3   : > { %767 = vst.msk [vmem:[#allocation2 + $0x1c] sm:$0xf] %vm759_vm11, %v750_v53  ;;  %766 = vst.msk [vmem:[#allocation2 + $0x18] sm:$0xf] %vm759_vm11, %v748_v54 }
  0xf6   : > { %v907_v55 = vpop.permute.xlu1 %906  ;;  %v905_v56 = vpop.permute.xlu0 %904 }
  0xf7   : > { %926 = vst.msk [vmem:[#allocation2 + $0x14] sm:$0xf] %vm920_vm12, %v907_v55  ;;  %925 = vst.msk [vmem:[#allocation2 + $0x10] sm:$0xf] %vm920_vm12, %v905_v56 }
  0xfa   : > { %v911_v57 = vpop.permute.xlu1 %910  ;;  %v909_v58 = vpop.permute.xlu0 %908 }
  0xfb   : > { %928 = vst.msk [vmem:[#allocation2 + $0x1c] sm:$0xf] %vm920_vm12, %v911_v57  ;;  %927 = vst.msk [vmem:[#allocation2 + $0x18] sm:$0xf] %vm920_vm12, %v909_v58 }
  0xfe   : > { %v1440_v59 = vld [vmem:[#allocation2 + $0x10] sm:$0xff]  }
  0xff   : > { %1356 = vmatprep.mubr.msk.bf16.mxu1 %vm977_vm13, %v1440_v59 }
 0x102   : > { %v1441_v60 = vld [vmem:[#allocation2 + $0x18] sm:$0xff]  }
 0x103   : > { %1357 = vmatmul.mubr.msk.bf16.vlgmr.msra.gmra.mxu1 %vm977_vm13, %v1441_v60 }
 0x18b   : > { %v1354_v61 = vpop.f32.mrf.mxu0 }
 0x18c   : > { %v1061_v62 = vpack.c.bf16 %v1354_v61, %v1354_v61  ;;  %v1102_v10 = vmul.f32 %v1354_v61, %v1354_v61  ;;  %v1080_v13 = vsel %vm1076_vm15, %v1354_v61, 0.0 }
 0x18d   : > { %v1028_v63 = vpop.f32.mrf.mxu0 }
 0x18e   : > { %1070 = vst.msk [vmem:[%s1954_s27 + $0x8] sm:$0xf] %vm1067_vm14, %v1061_v62  ;;  %v1059_v0 = vpack.c.bf16 %v1028_v63, %v1028_v63  ;;  %v1100_v6 = vmul.f32 %v1028_v63, %v1028_v63  ;;  %v1077_v8 = vsel %vm1076_vm15, %v1028_v63, 0.0  ;;  %v1111_v16 = vsel %vm1076_vm15, %v1102_v10, 0.0 }
 0x18f   : > { %v1355_v1 = vpop.f32.mrf.mxu0 }
 0x190   : > { %1068 = vst.msk [vmem:[%s1954_s27] sm:$0xf] %vm1067_vm14, %v1059_v0  ;;  %v1062_v2 = vpack.c.bf16 %v1355_v1, %v1355_v1  ;;  %v1108_v11 = vsel %vm1076_vm15, %v1100_v6, 0.0  ;;  %v1103_v17 = vmul.f32 %v1355_v1, %v1355_v1  ;;  %v1082_v21 = vsel %vm1076_vm15, %v1355_v1, 0.0 }
 0x191   : > { %v1031_v3 = vpop.f32.mrf.mxu0 }
 0x192   : > { %1071 = vst.msk [vmem:[%s1954_s27 + $0xc] sm:$0xf] %vm1067_vm14, %v1062_v2  ;;  %v1060_v4 = vpack.c.bf16 %v1031_v3, %v1031_v3  ;;  %v1101_v5 = vmul.f32 %v1031_v3, %v1031_v3  ;;  %v1078_v7 = vsel %vm1076_vm15, %v1031_v3, 0.0  ;;  %v1113_v27 = vsel %vm1076_vm15, %v1103_v17, 0.0 }
 0x193   : > { %v1079_v9 = vadd.f32 %v1078_v7, %v1077_v8 }
 0x194   : > { %1069 = vst.msk [vmem:[%s1954_s27 + $0x4] sm:$0xf] %vm1067_vm14, %v1060_v4  ;;  %v1109_v31 = vsel %vm1076_vm15, %v1101_v5, 0.0 }
 0x195   : > { %v1110_v12 = vadd.f32 %v1109_v31, %v1108_v11  ;;  %v1081_v14 = vadd.f32 %v1080_v13, %v1079_v9 }
 0x197   : > { %v1112_v19 = vadd.f32 %v1111_v16, %v1110_v12  ;;  %v1083_v25 = vadd.f32 %v1082_v21, %v1081_v14 }
 0x199   : > { %v1114_v32 = vadd.f32 %v1113_v27, %v1112_v19 }
 0x1c3   : > { %v1358_v15 = vpop.f32.mrf.mxu1 }
 0x1c4   : > { %v1065_v18 = vpack.c.bf16 %v1358_v15, %v1358_v15  ;;  %v1106_v34 = vmul.f32 %v1358_v15, %v1358_v15  ;;  %v1088_v40 = vsel %vm1076_vm15, %v1358_v15, 0.0 }
 0x1c5   : > { %v1044_v20 = vpop.f32.mrf.mxu1 }
 0x1c6   : > { %1074 = vst.msk [vmem:[%s1954_s27 + $0x18] sm:$0xf] %vm1067_vm14, %v1065_v18  ;;  %v1063_v22 = vpack.c.bf16 %v1044_v20, %v1044_v20  ;;  %v1084_v23 = vsel %vm1076_vm15, %v1044_v20, 0.0  ;;  %v1104_v24 = vmul.f32 %v1044_v20, %v1044_v20 }
 0x1c7   : > { %v1359_v26 = vpop.f32.mrf.mxu1  ;;  %v1085_v30 = vadd.f32 %v1084_v23, %v1083_v25 }
 0x1c8   : > { %1072 = vst.msk [vmem:[%s1954_s27 + $0x10] sm:$0xf] %vm1067_vm14, %v1063_v22  ;;  %v1115_v28 = vsel %vm1076_vm15, %v1104_v24, 0.0  ;;  %v1066_v29 = vpack.c.bf16 %v1359_v26, %v1359_v26  ;;  %v1107_v41 = vmul.f32 %v1359_v26, %v1359_v26 }
 0x1c9   : > { %v1047_v33 = vpop.f32.mrf.mxu1  ;;  %v1116_v38 = vadd.f32 %v1115_v28, %v1114_v32 }
 0x1ca   : > { %1075 = vst.msk [vmem:[%s1954_s27 + $0x1c] sm:$0xf] %vm1067_vm14, %v1066_v29  ;;  %v1064_v35 = vpack.c.bf16 %v1047_v33, %v1047_v33  ;;  %v1086_v36 = vsel %vm1076_vm15, %v1047_v33, 0.0  ;;  %v1105_v37 = vmul.f32 %v1047_v33, %v1047_v33 }
 0x1cb   : > { %v1087_v39 = vadd.f32 %v1086_v36, %v1085_v30 }
 0x1cc   : > { %1073 = vst.msk [vmem:[%s1954_s27 + $0x14] sm:$0xf] %vm1067_vm14, %v1064_v35  ;;  %v1117_v42 = vsel %vm1076_vm15, %v1105_v37, 0.0 }
 0x1cd   : > { %v1089_v43 = vadd.f32 %v1088_v40, %v1087_v39  ;;  %v1118_v44 = vadd.f32 %v1117_v42, %v1116_v38 }
 0x1ce   : > { %1455 = shalt.err (!%p1452_p5)
}
 0x1cf   : > { %s1456_s18 = scalar_lea.hbm %s1983_s6, 512  ;;  %s1460_s26 = scalar_lea.hbm %s2063_s2, 1024 }
 0x1d0   : > { %p1457_p6 = scmp.ne.s32.totalorder %s1983_s6, %s1456_s18  ;;  %p1461_p10 = scmp.lt.s32.totalorder %s1983_s6, %s2063_s2 }
 0x1d1   : > { %p1462_p11 = scmp.lt.s32.totalorder %s1460_s26, %s1456_s18 }
 0x1d2   : > { %p1458_p7 = pnand %p1457_p6, %p1618_p4 }
 0x1d3   : > { %p1463_p12 = por %p1462_p11, %p1461_p10 }
 0x1d4   : > { %p1459_p9 = pneg %p1458_p7 }
 0x1d6   : > { %p1464_p13 = pnand %p1463_p12, %p1459_p9 }
 0x1d8   : > { %1467 = shalt.err (!%p1464_p13)
}
 0x1d9   : > { %s1556_s30 = smov 64   ;;  %v1119_v45 = vsel %vm1076_vm15, %v1106_v34, 0.0  ;;  %v1090_v46 = vsel %vm1076_vm15, %v1359_v26, 0.0  ;;  %v1121_v49 = vsel %vm1076_vm15, %v1107_v41, 0.0  ;;  %s1286_s5 = sshll.u32 %s1951_s23, 1  ;;  %vm1098_vm0 = vcmask 57344  }
 0x1da   : > { %1369 = dma.vmem_to_hbm [thread:$0]  (%p1618_p4), %s1988_s29, 512, %s1983_s6, %s1131_s7, %s1556_s30, %s1556_s30, %s1550_s4   ;;  %v1091_v47 = vadd.f32 %v1090_v46, %v1089_v43  ;;  %v1120_v48 = vadd.f32 %v1119_v45, %v1118_v44 }
 0x1db   : > { %s1335_s4 = sshll.u32 %s1540_s15, 5  ;;  %s200_s29 = scalar_lea.vmem [#allocation5], %s1286_s5 }
 0x1dc   : > { %v1092_v50 = vrot.slane %v1091_v47, 4  ;;  %v1122_v51 = vadd.f32 %v1121_v49, %v1120_v48  ;;  %s1168_s6 = sshll.u32 %s200_s29, 4  ;;  %s1166_s9 = scalar_lea.hbm %s2064_s3, %s1335_s4  ;;  %s1169_s6 = int_to_ptr.vmem [resolvable:$true] %s1168_s6 }
 0x1dd   : > { %s1136_s10 = scalar_lea.sflag [#allocation6], %s1951_s23  ;;  %s1468_s11 = scalar_lea.vmem %s1169_s6, 32 }
 0x1de   : > { %v1093_v52 = vadd.f32 %v1092_v50, %v1091_v47  ;;  %v1123_v53 = vrot.slane %v1122_v51, 4  ;;  %p1469_p0 = scmp.ne.s32.totalorder %s1169_s6, %s1468_s11  ;;  %s1557_s18 = smov [#allocation5]  }
 0x1df   : > { %s1472_s15 = sshll.u32 %s1557_s18, 4  ;;  %s1473_s15 = int_to_ptr.vmem [resolvable:$false] %s1472_s15 }
 0x1e0   : > { %v1094_v54 = vrot.slane %v1093_v52, 2  ;;  %v1124_v55 = vadd.f32 %v1123_v53, %v1122_v51  ;;  %p1470_p1 = pnand %p1469_p0, %p1618_p4  ;;  %s1474_s19 = scalar_lea.vmem %s1473_s15, 64 }
 0x1e1   : > { %p1475_p3 = scmp.lt.s32.totalorder %s1169_s6, %s1473_s15  ;;  %p1476_p5 = scmp.lt.s32.totalorder %s1474_s19, %s1468_s11 }
 0x1e2   : > { %v1095_v56 = vadd.f32 %v1094_v54, %v1093_v52  ;;  %v1125_v57 = vrot.slane %v1124_v55, 2  ;;  %p1471_p2 = pneg %p1470_p1 }
 0x1e3   : > { %p1477_p6 = por %p1476_p5, %p1475_p3 }
 0x1e4   : > { %v1096_v58 = vrot.slane %v1095_v56, 1  ;;  %v1126_v59 = vadd.f32 %v1125_v57, %v1124_v55 }
 0x1e5   : > { %p1478_p7 = pnand %p1477_p6, %p1471_p2 }
 0x1e6   : > { %v1097_v60 = vadd.f32 %v1096_v58, %v1095_v56  ;;  %v1127_v61 = vrot.slane %v1126_v59, 1 }
 0x1e8   : > { %1099 = vst.msk [vmem:[%s200_s29] sm:$0x1] %vm1098_vm0, %v1097_v60  ;;  %v1128_v62 = vadd.f32 %v1127_v61, %v1126_v59 }
 0x1ea   : > { %1129 = vst.msk [vmem:[%s200_s29 + $0x1] sm:$0x1] %vm1098_vm0, %v1128_v62 }
 0x1eb   : > { %1481 = shalt.err (!%p1478_p7)
}
 0x1ec   : > { %s1482_s21 = scalar_lea.hbm %s1166_s9, 32  ;;  %s1486_s27 = scalar_lea.hbm %s2064_s3, 64 }
 0x1ed   : > { %p1483_p9 = scmp.ne.s32.totalorder %s1166_s9, %s1482_s21  ;;  %p1487_p12 = scmp.lt.s32.totalorder %s1166_s9, %s2064_s3 }
 0x1ee   : > { %p1488_p13 = scmp.lt.s32.totalorder %s1486_s27, %s1482_s21 }
 0x1ef   : > { %p1484_p10 = pnand %p1483_p9, %p1618_p4 }
 0x1f0   : > { %p1489_p0 = por %p1488_p13, %p1487_p12 }
 0x1f1   : > { %p1485_p11 = pneg %p1484_p10 }
 0x1f3   : > { %p1490_p1 = pnand %p1489_p0, %p1485_p11 }
 0x1f5   : > { %1493 = shalt.err (!%p1490_p1)
}
 0x1f6   : > { %1370 = dma.vmem_to_hbm [thread:$0]  (%p1618_p4), %s1169_s6, 32, %s1166_s9, %s1136_s10  }
 0x1f7 PF: > { %p1380_p2 = scmp.ge.s32.totalorder %s1548_s17, 2  ;;  %s1180_s5 = sand.u32 1, %s1528_s12  }
 0x1f8   : > { %s1181_s4 = scalar_lea.sflag [#allocation4], %s1180_s5 }
 0x1f9   : > { %p1374_p3 = pnand %p1380_p2, %p1625_p8 }
 0x1fb   : > { %p1375_p5 = pneg %p1374_p3 }
 0x1fd   : > { %1519 = dma.done.wait (%p1375_p5), %s1181_s4, 512  }
 0x1fe   : > { %1521 = vsyncadd (%p1375_p5), %s1181_s4, 4294966784  ;;  %s1190_s29 = scalar_lea.sflag [#allocation6], %s1180_s5 }
 0x1ff   : > { %1523 = dma.done.wait (%p1375_p5), %s1190_s29, 32  }
 0x200   : > { %1525 = vsyncadd (%p1375_p5), %s1190_s29, 4294967264  ;;  %s20_s17 = sadd.s32 1, %s1548_s17   ;;  %s2069_s12 = smov %s1532_s13 }
 0x201   : > { %p17_p6 = scmp.ge.s32.totalorder %s20_s17, 4   ;;  %s2070_s13 = smov %s1536_s14 }
 0x202   : > { %s2071_s14 = smov %s1631_s25  ;;  %s2072_s15 = smov %s1544_s16 }
 0x203   : > { %s2073_s16 = smov %s2075_s20  ;;  %19 = sbr.rel (!%p17_p6) target bundleno = 6 (0x6), region = 81 }
 0x208   :  { %1195 = vsyncpa [#allocation4], 1 }
 0x209   :  { %1197 = vsyncpa [#allocation4 + $0x1], 1 }
 0x20a   :  { %1198 = vsyncpa [#allocation6], 1 }
 0x20b   :  { %1200 = vsyncpa [#allocation6 + $0x1], 1 }

</bundles_post_ra>
